<compile_context>
chip_gen: v6e
topology: v6e:2x2x1
jax: 0.10.0
libtpu: 0.0.40
codegen_flags: <defaults>
</compile_context>

<pallas_src>
import functools

import jax
import jax.numpy as jnp
from jax import lax
from jax.experimental import pallas as pl
from jax.experimental.pallas import tpu as pltpu


# -----------------------------------------------------------------------------
# Fused kernel for one image:
#   relu(bn1) -> 1x1 conv (bn2 scale pre-folded) -> +bn2 shift -> relu
#   -> 3x3 conv (single deep-K matmul over an im2col slab).
# All arrays are (channels, H*W): channels on sublanes, spatial on lanes.
# -----------------------------------------------------------------------------
def _bottleneck_kernel(x_ref, w1_ref, s1_ref, b1_ref, b2_ref, w2_ref, o_ref,
                       *, H, W, cin, cinter, cout, compute_dtype):
    del cin, cout  # shapes carried by the refs
    f32 = jnp.float32
    L = H * W

    # ---- bn1 + relu (elementwise, full-lane vregs) --------------------------
    xr = x_ref[0]                                            # (cin, L)
    hpre = jnp.maximum(xr * s1_ref[...] + b1_ref[...], 0.0)  # (cin, L)

    # ---- 1x1 conv as (cinter, cin) @ (cin, L); bn2 shift + relu -------------
    a1 = jnp.dot(w1_ref[...].astype(compute_dtype),
                 hpre.astype(compute_dtype),
                 preferred_element_type=f32)                 # (cinter, L)
    a1 = jnp.maximum(a1 + b2_ref[...], 0.0)

    # ---- build im2col slab with zero-filled lane shifts ---------------------
    # Zero lane-padding of width W+1 on each side means every tap's shifted
    # view is a static in-bounds slice, and out-of-image rows (conv2's H
    # zero padding) read zeros automatically.  The only positions that would
    # read a *wrong* (wrapped-into-adjacent-row) value are the W-boundary
    # columns of the kw=0 / kw=2 taps, which are masked to zero below --
    # exactly conv2's W zero padding (masking before a linear op is valid).
    pad = W + 1
    zpad = jnp.zeros((cinter, pad), f32)
    a1_ext = jnp.concatenate([zpad, a1, zpad], axis=1)       # (cinter, L+2W+2)

    wpos = lax.broadcasted_iota(jnp.int32, (1, L), 1) % W
    left_ok = (wpos != 0).astype(f32)                        # kw=0 invalid at w==0
    right_ok = (wpos != W - 1).astype(f32)                   # kw=2 invalid at w==W-1

    slabs = []
    for kh in range(3):
        for kw in range(3):
            s = (kh - 1) * W + (kw - 1)                      # spatial shift
            slab = a1_ext[:, pad + s: pad + s + L]           # (cinter, L)
            if kw == 0:
                slab = slab * left_ok
            elif kw == 2:
                slab = slab * right_ok
            slabs.append(slab)
    # Sublane concat of 8-aligned (cinter, L) pieces -> (9*cinter, L), cheap.
    im2col = jnp.concatenate(slabs, axis=0)

    # ---- 3x3 conv as ONE matmul: (cout, 9*cinter) @ (9*cinter, L) -----------
    acc = jnp.dot(w2_ref[...].astype(compute_dtype),
                  im2col.astype(compute_dtype),
                  preferred_element_type=f32)                # (cout, L)

    # Lane-dense store: last dim L (= H*W, multiple of 128 here), unmasked.
    o_ref[0] = acc


# -----------------------------------------------------------------------------
# Wrapper: BN folding, weight prep, pallas_call, channel concat.
# -----------------------------------------------------------------------------
def bottleneck_block_forward(x_nchw, params, *, compute_dtype=jnp.float32):
    """x_nchw: (N, Cin, H, W) float32. Returns (N, Cin + Cout, H, W)."""
    N, cin, H, W = x_nchw.shape
    L = H * W
    eps = 1e-5

    # Fold eval-mode BatchNorm into per-channel scale/shift.
    s1 = params["bn1_gamma"] / jnp.sqrt(params["bn1_var"] + eps)
    b1 = params["bn1_beta"] - params["bn1_mean"] * s1
    s2 = params["bn2_gamma"] / jnp.sqrt(params["bn2_var"] + eps)
    b2 = params["bn2_beta"] - params["bn2_mean"] * s2

    w1 = params["conv1_w"]                  # (Cinter, Cin, 1, 1)  OIHW
    w2 = params["conv2_w"]                  # (Cout, Cinter, 3, 3) OIHW
    cinter, cout = w1.shape[0], w2.shape[0]

    # 1x1 conv weight with bn2's scale folded into its output channels.
    w1_eff = w1.reshape(cinter, cin) * s2[:, None]           # (Cinter, Cin)
    # 3x3 weights flattened so row order matches the kernel's (kh, kw, cinter)
    # im2col row ordering: (Cout, 9*Cinter).
    w2_eff = jnp.transpose(w2, (0, 2, 3, 1)).reshape(cout, 9 * cinter)

    # NCHW with flattened spatial -> (N, Cin, H*W); a free reshape, no transpose.
    x_flat = x_nchw.reshape(N, cin, L)

    kernel = functools.partial(_bottleneck_kernel, H=H, W=W, cin=cin,
                               cinter=cinter, cout=cout,
                               compute_dtype=compute_dtype)

    conv_flat = pl.pallas_call(
        kernel,
        out_shape=jax.ShapeDtypeStruct((N, cout, L), jnp.float32),
        grid_spec=pltpu.PrefetchScalarGridSpec(
            num_scalar_prefetch=0,
            grid=(N,),                                        # whole image per step
            in_specs=[
                pl.BlockSpec((1, cin, L), lambda n: (n, 0, 0)),
                pl.BlockSpec((cinter, cin), lambda n: (0, 0)),
                pl.BlockSpec((cin, 1), lambda n: (0, 0)),
                pl.BlockSpec((cin, 1), lambda n: (0, 0)),
                pl.BlockSpec((cinter, 1), lambda n: (0, 0)),
                pl.BlockSpec((cout, 9 * cinter), lambda n: (0, 0)),
            ],
            out_specs=pl.BlockSpec((1, cout, L), lambda n: (n, 0, 0)),
        ),
        compiler_params=pltpu.CompilerParams(
            dimension_semantics=("parallel",)),               # N>=2 -> both v7x TCs busy
    )(x_flat, w1_eff, s1.reshape(cin, 1), b1.reshape(cin, 1),
      b2.reshape(cinter, 1), w2_eff)

    conv = conv_flat.reshape(N, cout, H, W)
    # Channel concat done here (contiguous per-image copy, fused by XLA)
    # instead of copying x through the kernel.
    return jnp.concatenate([x_nchw, conv], axis=1)


# -----------------------------------------------------------------------------
# Reference (pure JAX/XLA) for verification
# -----------------------------------------------------------------------------
def reference_forward(x, params):
    eps = 1e-5
    s1 = params["bn1_gamma"] / jnp.sqrt(params["bn1_var"] + eps)
    b1 = params["bn1_beta"] - params["bn1_mean"] * s1
    s2 = params["bn2_gamma"] / jnp.sqrt(params["bn2_var"] + eps)
    b2 = params["bn2_beta"] - params["bn2_mean"] * s2

    h1 = jnp.maximum(x * s1[None, :, None, None] + b1[None, :, None, None], 0.0)
    c1 = lax.conv_general_dilated(
        h1, params["conv1_w"], (1, 1), "VALID",
        dimension_numbers=("NCHW", "OIHW", "NCHW"))
    h2 = jnp.maximum(c1 * s2[None, :, None, None] + b2[None, :, None, None], 0.0)
    c2 = lax.conv_general_dilated(
        h2, params["conv2_w"], (1, 1), ((1, 1), (1, 1)),
        dimension_numbers=("NCHW", "OIHW", "NCHW"))
    return jnp.concatenate([x, c2], axis=1)


def init_params(key, in_channels, out_channels):
    inter = out_channels * 4
    ks = jax.random.split(key, 10)
    return {
        "bn1_gamma": jax.random.uniform(ks[0], (in_channels,), jnp.float32, 0.5, 1.5),
        "bn1_beta": 0.1 * jax.random.normal(ks[1], (in_channels,), jnp.float32),
        "bn1_mean": 0.1 * jax.random.normal(ks[2], (in_channels,), jnp.float32),
        "bn1_var": jax.random.uniform(ks[3], (in_channels,), jnp.float32, 0.5, 1.5),
        "conv1_w": 0.2 * jax.random.normal(ks[4], (inter, in_channels, 1, 1), jnp.float32),
        "bn2_gamma": jax.random.uniform(ks[5], (inter,), jnp.float32, 0.5, 1.5),
        "bn2_beta": 0.1 * jax.random.normal(ks[6], (inter,), jnp.float32),
        "bn2_mean": 0.1 * jax.random.normal(ks[7], (inter,), jnp.float32),
        "bn2_var": jax.random.uniform(ks[8], (inter,), jnp.float32, 0.5, 1.5),
        "conv2_w": 0.2 * jax.random.normal(ks[9], (out_channels, inter, 3, 3), jnp.float32),
    }


if __name__ == "__main__":
    N, C_IN, C_OUT, H, W = 2, 4, 4, 16, 16   # inter_planes = 16

    key = jax.random.PRNGKey(0)
    kx, kp = jax.random.split(key)
    x = jax.random.normal(kx, (N, C_IN, H, W), jnp.float32)
    params = init_params(kp, C_IN, C_OUT)

    # Default keeps matmul operands in f32 for a tight check; on v6e/v7x pass
    # compute_dtype=jnp.bfloat16 (and loosen the tolerance) for ~2x MXU rate.
    out = jax.block_until_ready(bottleneck_block_forward(x, params))
    ref = jax.block_until_ready(reference_forward(x, params))

    assert out.shape == (N, C_IN + C_OUT, H, W), out.shape
    assert jnp.allclose(out, ref, atol=1e-4, rtol=1e-4), float(
        jnp.max(jnp.abs(out - ref)))

    print("KERNEL_OK")
</pallas_src>

<mosaic_0001>
module attributes {stable_mosaic.version = 11 : i64} {
  func.func @_bottleneck_kernel(%arg0: i32, %arg1: memref<1x4x256xf32, #tpu.memory_space<vmem>>, %arg2: memref<16x4xf32, #tpu.memory_space<vmem>>, %arg3: memref<4x1xf32, #tpu.memory_space<vmem>>, %arg4: memref<4x1xf32, #tpu.memory_space<vmem>>, %arg5: memref<16x1xf32, #tpu.memory_space<vmem>>, %arg6: memref<4x144xf32, #tpu.memory_space<vmem>>, %arg7: memref<1x4x256xf32, #tpu.memory_space<vmem>>) attributes {dimension_semantics = [#tpu.dimension_semantics<parallel>], iteration_bounds = array<i64: 2>, scalar_prefetch = 0 : i64, scratch_operands = 0 : i64, tpu.core_type = #tpu.core_type<tc>, window_params = [{transform_indices = @transform_0, window_bounds = array<i64: 1, 4, 256>}, {pipeline_mode = #tpu.pipeline_mode<synchronous>, transform_indices = @transform_1, window_bounds = array<i64: 16, 4>}, {pipeline_mode = #tpu.pipeline_mode<synchronous>, transform_indices = @transform_2, window_bounds = array<i64: 4, 1>}, {pipeline_mode = #tpu.pipeline_mode<synchronous>, transform_indices = @transform_3, window_bounds = array<i64: 4, 1>}, {pipeline_mode = #tpu.pipeline_mode<synchronous>, transform_indices = @transform_4, window_bounds = array<i64: 16, 1>}, {pipeline_mode = #tpu.pipeline_mode<synchronous>, transform_indices = @transform_5, window_bounds = array<i64: 4, 144>}, {transform_indices = @transform_6, window_bounds = array<i64: 1, 4, 256>}]} {
    %c0 = arith.constant 0 : index
    %c0_0 = arith.constant 0 : index
    %c0_1 = arith.constant 0 : index
    %0 = vector.load %arg1[%c0, %c0_0, %c0_1] : memref<1x4x256xf32, #tpu.memory_space<vmem>>, vector<1x4x256xf32>
    %1 = vector.shape_cast %0 : vector<1x4x256xf32> to vector<4x256xf32>
    %c0_2 = arith.constant 0 : index
    %c0_3 = arith.constant 0 : index
    %2 = vector.load %arg3[%c0_2, %c0_3] : memref<4x1xf32, #tpu.memory_space<vmem>>, vector<4x1xf32>
    %3 = vector.broadcast %2 : vector<4x1xf32> to vector<4x256xf32>
    %4 = arith.mulf %1, %3 : vector<4x256xf32>
    %c0_4 = arith.constant 0 : index
    %c0_5 = arith.constant 0 : index
    %5 = vector.load %arg4[%c0_4, %c0_5] : memref<4x1xf32, #tpu.memory_space<vmem>>, vector<4x1xf32>
    %6 = vector.broadcast %5 : vector<4x1xf32> to vector<4x256xf32>
    %7 = arith.addf %4, %6 : vector<4x256xf32>
    %cst = arith.constant 0.000000e+00 : f32
    %8 = vector.broadcast %cst : f32 to vector<4x256xf32>
    %9 = arith.maximumf %7, %8 : vector<4x256xf32>
    %c0_6 = arith.constant 0 : index
    %c0_7 = arith.constant 0 : index
    %10 = vector.load %arg2[%c0_6, %c0_7] : memref<16x4xf32, #tpu.memory_space<vmem>>, vector<16x4xf32>
    %cst_8 = arith.constant dense<0.000000e+00> : vector<16x256xf32>
    %11 = tpu.matmul %10, %9, %cst_8 {dimension_numbers = #tpu.dot_dimension_numbers<[1], [0], [0], [1], [0, 0, 1, 1], [], []>} : vector<16x4xf32>, vector<4x256xf32>, vector<16x256xf32> -> vector<16x256xf32>
    %c0_9 = arith.constant 0 : index
    %c0_10 = arith.constant 0 : index
    %12 = vector.load %arg5[%c0_9, %c0_10] : memref<16x1xf32, #tpu.memory_space<vmem>>, vector<16x1xf32>
    %13 = vector.broadcast %12 : vector<16x1xf32> to vector<16x256xf32>
    %14 = arith.addf %11, %13 : vector<16x256xf32>
    %cst_11 = arith.constant 0.000000e+00 : f32
    %15 = vector.broadcast %cst_11 : f32 to vector<16x256xf32>
    %16 = arith.maximumf %14, %15 : vector<16x256xf32>
    %cst_12 = arith.constant 0.000000e+00 : f32
    %17 = vector.broadcast %cst_12 : f32 to vector<16x17xf32>
    %18 = tpu.concatenate %17, %16, %17 in 1 : vector<16x17xf32>, vector<16x256xf32>, vector<16x17xf32> -> vector<16x290xf32>
    %19 = tpu.iota {dimensions = array<i32: 1>} : vector<1x256xi32>
    %c16_i32 = arith.constant 16 : i32
    %c0_i32 = arith.constant 0 : i32
    %20 = arith.cmpi eq, %c16_i32, %c0_i32 : i32
    %c1_i32 = arith.constant 1 : i32
    %21 = arith.select %20, %c1_i32, %c16_i32 : i32
    %22 = vector.broadcast %21 : i32 to vector<1x256xi32>
    %23 = arith.remsi %19, %22 : vector<1x256xi32>
    %c0_i32_13 = arith.constant 0 : i32
    %24 = vector.broadcast %c0_i32_13 : i32 to vector<1x256xi32>
    %25 = arith.cmpi ne, %23, %24 : vector<1x256xi32>
    %c0_i32_14 = arith.constant 0 : i32
    %26 = vector.broadcast %c0_i32_14 : i32 to vector<1x256xi32>
    %27 = arith.cmpi slt, %23, %26 : vector<1x256xi32>
    %c0_i32_15 = arith.constant 0 : i32
    %28 = arith.cmpi slt, %21, %c0_i32_15 : i32
    %29 = vector.broadcast %28 : i1 to vector<1x256xi1>
    %30 = vector.broadcast %29 : vector<1x256xi1> to vector<1x256xi1>
    %31 = arith.xori %27, %30 : vector<1x256xi1>
    %32 = arith.andi %31, %25 : vector<1x256xi1>
    %33 = vector.broadcast %21 : i32 to vector<1x256xi32>
    %34 = arith.addi %23, %33 : vector<1x256xi32>
    %35 = arith.select %32, %34, %23 : vector<1x256xi1>, vector<1x256xi32>
    %c0_i32_16 = arith.constant 0 : i32
    %36 = vector.broadcast %c0_i32_16 : i32 to vector<1x256xi32>
    %37 = arith.cmpi ne, %35, %36 : vector<1x256xi32>
    %38 = arith.extui %37 : vector<1x256xi1> to vector<1x256xi32>
    %39 = arith.sitofp %38 : vector<1x256xi32> to vector<1x256xf32>
    %c15_i32 = arith.constant 15 : i32
    %40 = vector.broadcast %c15_i32 : i32 to vector<1x256xi32>
    %41 = arith.cmpi ne, %35, %40 : vector<1x256xi32>
    %42 = arith.extui %41 : vector<1x256xi1> to vector<1x256xi32>
    %43 = arith.sitofp %42 : vector<1x256xi32> to vector<1x256xf32>
    %44 = vector.extract_strided_slice %18 {offsets = [0, 0], sizes = [16, 256], strides = [1, 1]} : vector<16x290xf32> to vector<16x256xf32>
    %45 = vector.broadcast %39 : vector<1x256xf32> to vector<16x256xf32>
    %46 = arith.mulf %44, %45 : vector<16x256xf32>
    %47 = vector.extract_strided_slice %18 {offsets = [0, 1], sizes = [16, 256], strides = [1, 1]} : vector<16x290xf32> to vector<16x256xf32>
    %48 = vector.extract_strided_slice %18 {offsets = [0, 2], sizes = [16, 256], strides = [1, 1]} : vector<16x290xf32> to vector<16x256xf32>
    %49 = vector.broadcast %43 : vector<1x256xf32> to vector<16x256xf32>
    %50 = arith.mulf %48, %49 : vector<16x256xf32>
    %51 = vector.extract_strided_slice %18 {offsets = [0, 16], sizes = [16, 256], strides = [1, 1]} : vector<16x290xf32> to vector<16x256xf32>
    %52 = vector.broadcast %39 : vector<1x256xf32> to vector<16x256xf32>
    %53 = arith.mulf %51, %52 : vector<16x256xf32>
    %54 = vector.extract_strided_slice %18 {offsets = [0, 17], sizes = [16, 256], strides = [1, 1]} : vector<16x290xf32> to vector<16x256xf32>
    %55 = vector.extract_strided_slice %18 {offsets = [0, 18], sizes = [16, 256], strides = [1, 1]} : vector<16x290xf32> to vector<16x256xf32>
    %56 = vector.broadcast %43 : vector<1x256xf32> to vector<16x256xf32>
    %57 = arith.mulf %55, %56 : vector<16x256xf32>
    %58 = vector.extract_strided_slice %18 {offsets = [0, 32], sizes = [16, 256], strides = [1, 1]} : vector<16x290xf32> to vector<16x256xf32>
    %59 = vector.broadcast %39 : vector<1x256xf32> to vector<16x256xf32>
    %60 = arith.mulf %58, %59 : vector<16x256xf32>
    %61 = vector.extract_strided_slice %18 {offsets = [0, 33], sizes = [16, 256], strides = [1, 1]} : vector<16x290xf32> to vector<16x256xf32>
    %62 = vector.extract_strided_slice %18 {offsets = [0, 34], sizes = [16, 256], strides = [1, 1]} : vector<16x290xf32> to vector<16x256xf32>
    %63 = vector.broadcast %43 : vector<1x256xf32> to vector<16x256xf32>
    %64 = arith.mulf %62, %63 : vector<16x256xf32>
    %65 = tpu.concatenate %46, %47, %50, %53, %54, %57, %60, %61, %64 in 0 : vector<16x256xf32>, vector<16x256xf32>, vector<16x256xf32>, vector<16x256xf32>, vector<16x256xf32>, vector<16x256xf32>, vector<16x256xf32>, vector<16x256xf32>, vector<16x256xf32> -> vector<144x256xf32>
    %c0_17 = arith.constant 0 : index
    %c0_18 = arith.constant 0 : index
    %66 = vector.load %arg6[%c0_17, %c0_18] : memref<4x144xf32, #tpu.memory_space<vmem>>, vector<4x144xf32>
    %cst_19 = arith.constant dense<0.000000e+00> : vector<4x256xf32>
    %67 = tpu.matmul %66, %65, %cst_19 {dimension_numbers = #tpu.dot_dimension_numbers<[1], [0], [0], [1], [0, 0, 1, 1], [], []>} : vector<4x144xf32>, vector<144x256xf32>, vector<4x256xf32> -> vector<4x256xf32>
    %c0_20 = arith.constant 0 : index
    %c0_21 = arith.constant 0 : index
    %c0_22 = arith.constant 0 : index
    %68 = vector.load %arg7[%c0_20, %c0_21, %c0_22] : memref<1x4x256xf32, #tpu.memory_space<vmem>>, vector<1x4x256xf32>
    %69 = vector.shape_cast %68 : vector<1x4x256xf32> to vector<4x256xf32>
    %70 = vector.shape_cast %67 : vector<4x256xf32> to vector<1x4x256xf32>
    tpu.vector_store %arg7[%c0_20, %c0_21, %c0_22], %70 {strides = array<i32>} : memref<1x4x256xf32, #tpu.memory_space<vmem>>, vector<1x4x256xf32>,
    return
  }
  func.func @transform_0(%arg0: i32) -> (i32, i32, i32) {
    %c0_i32 = arith.constant 0 : i32
    %c0_i32_0 = arith.constant 0 : i32
    %c0_i32_1 = arith.constant 0 : i32
    return %arg0, %c0_i32, %c0_i32_0 : i32, i32, i32
  }
  func.func @transform_1(%arg0: i32) -> (i32, i32) {
    %c0_i32 = arith.constant 0 : i32
    %c0_i32_0 = arith.constant 0 : i32
    %c0_i32_1 = arith.constant 0 : i32
    return %c0_i32, %c0_i32_0 : i32, i32
  }
  func.func @transform_2(%arg0: i32) -> (i32, i32) {
    %c0_i32 = arith.constant 0 : i32
    %c0_i32_0 = arith.constant 0 : i32
    %c0_i32_1 = arith.constant 0 : i32
    return %c0_i32, %c0_i32_0 : i32, i32
  }
  func.func @transform_3(%arg0: i32) -> (i32, i32) {
    %c0_i32 = arith.constant 0 : i32
    %c0_i32_0 = arith.constant 0 : i32
    %c0_i32_1 = arith.constant 0 : i32
    return %c0_i32, %c0_i32_0 : i32, i32
  }
  func.func @transform_4(%arg0: i32) -> (i32, i32) {
    %c0_i32 = arith.constant 0 : i32
    %c0_i32_0 = arith.constant 0 : i32
    %c0_i32_1 = arith.constant 0 : i32
    return %c0_i32, %c0_i32_0 : i32, i32
  }
  func.func @transform_5(%arg0: i32) -> (i32, i32) {
    %c0_i32 = arith.constant 0 : i32
    %c0_i32_0 = arith.constant 0 : i32
    %c0_i32_1 = arith.constant 0 : i32
    return %c0_i32, %c0_i32_0 : i32, i32
  }
  func.func @transform_6(%arg0: i32) -> (i32, i32, i32) {
    %c0_i32 = arith.constant 0 : i32
    %c0_i32_0 = arith.constant 0 : i32
    %c0_i32_1 = arith.constant 0 : i32
    return %arg0, %c0_i32, %c0_i32_0 : i32, i32, i32
  }
}

</mosaic_0001>

<bundles_post_ra>
// kernel: tpu_custom_call.1
= control target key start
LH: loop header
LB: loop body
LE: loop exit
PB: predicated region body
PF: predicated region fallthrough
CT: control target
= control target key end

     0   :  { %11 = vsyncpa [#allocation3], 0  ;;  %s1379_s0 = inlined_call_operand.vmem [shape: f32[2,4,256], index: 0, kind: input, shape index: {}]   ;;  %s1380_s1 = inlined_call_operand.vmem [shape: f32[16,4], index: 1, kind: input, shape index: {}]   ;;  %s1381_s2 = inlined_call_operand.vmem [shape: f32[4,1], index: 2, kind: input, shape index: {}]   ;;  %s1382_s3 = inlined_call_operand.vmem [shape: f32[4,1], index: 3, kind: input, shape index: {}]   ;;  %s1383_s4 = inlined_call_operand.vmem [shape: f32[16,1], index: 4, kind: input, shape index: {}]   ;;  %s1384_s5 = inlined_call_operand.vmem [shape: f32[4,144], index: 5, kind: input, shape index: {}]   ;;  %s1385_s6 = inlined_call_operand.hbm [shape: f32[2,4,256], index: 6, kind: output, shape index: {}]  }
   0x1   :  { %13 = vsyncpa [#allocation3 + $0x1], 0  ;;  %s1115_s21 = smov 0   ;;  %s1117_s22 = smov 0  }
   0x2   :  { %s1119_s23 = smov 0   ;;  %s1121_s24 = smov 0  }
   0x3 LB: > { %s1136_s25 = sadd.s32 4294967295, %s1060_s24   ;;  %s893_s26 = sadd.s32 4294967294, %s1060_s24   ;;  %s1060_s24 = sphi %s1121_s24, %s1391_s24   ;;  %s1056_s23 = sphi %s1119_s23, %s1390_s23   ;;  %s1052_s22 = sphi %s1117_s22, %s1389_s22   ;;  %s1048_s21 = sphi %s1115_s21, %s1388_s21  }
   0x4   : > { %s1140_s27 = sadd.s32 1, %s1060_s24   ;;  %s157_s28 = sadd.s32 1, %s1056_s23 }
   0x5   : > { %s154_s29 = ssub.s32 %s1060_s24, %s1140_s27  ;;  %p167_p0 = scmp.ne.s32.totalorder %s1056_s23, %s1052_s22 }
   0x6   : > { %p155_p1 = scmp.eq.s32.totalorder %s154_s29, 0  ;;  %p168_p2 = scmp.eq.s32.totalorder %s1136_s25, 1 }
   0x7   : > { %p173_p3 = scmp.ne.s32.totalorder %s1052_s22, %s1048_s21  ;;  %p174_p4 = scmp.eq.s32.totalorder %s893_s26, 1 }
   0x8   : > { %s1151_s30 = scalar_select %p155_p1, %s1056_s23, %s157_s28  }
   0x9   : > { %p1153_p5 = por %p168_p2, %p167_p0  ;;  %p1157_p6 = por %p174_p4, %p173_p3 }
   0xa   : > { %p896_p7 = scmp.ge.s32.totalorder %s1060_s24, 1  ;;  %p215_p8 = scmp.lt.s32.totalorder %s1060_s24, 3 }
   0xc   : > { %p216_p9 = pnand %p896_p7, %p215_p8 }
   0xd   : > { %s1064_s17 = smov (!%p216_p9), 32   ;;  %s1065_s18 = smov (!%p216_p9), 18  }
   0xe   : > { %219 = sbr.rel (%p216_p9) target bundleno = 894 (0x37e), region = 44  ;;  %s1066_s19 = smov (!%p216_p9), 16  }
   0xf   : > { %p245_p10 = scmp.lt.s32.totalorder (!%p216_p9), %s1136_s25, 1  ;;  %s1068_s14 = smov (!%p216_p9), 34  }
  0x10   : > { %s1069_s15 = smov (!%p216_p9), 2   ;;  %s1070_s16 = smov (!%p216_p9), 17  }
  0x11   : > { %s1076_s28 = smov (!%p216_p9), 126   ;;  %s1077_s29 = smov (!%p216_p9), 127  }
  0x12   : > { %s1078_s11 = smov (!%p216_p9), 94   ;;  %s242_s12 = sand.u32 (!%p216_p9), 1, %s1052_s22  }
  0x13   : > { %v251_v0 = vld [vmem:[%s1381_s2] sm:$0xf]  ;;  %v1062_v1 = vmov 0   ;;  %v259_v3 = vlaneseq  ;;  %v1063_v5 = vmov 0.0   ;;  %v283_v8 = vld [vmem:[%s1383_s4 + $0x8] sm:$0xff]  ;;  %s246_s20 = scalar_select %p245_p10, %s1136_s25, 1 }
  0x14   : > { %972 = vset.pattern.permute.xlu0 %v1062_v1  ;;  %973 = vset.pattern.permute.xlu1 %v1062_v1  ;;  %v265_v2 = vld [vmem:[%s1382_s3] sm:$0xf]  ;;  %v1067_v17 = vmov 839922192   ;;  %vm303_vm4 = vcmask 1043456   ;;  %vm296_vm5 = vcmask 31744  }
  0x15   : > { %254 = vperm.xlu0 %972, %v251_v0   ;;  %v415_v4 = vand.u32 127, %v259_v3  ;;  %372 = vmatprep.mubr.f32.mxu0 %v1063_v5  ;;  %v282_v11 = vld [vmem:[%s1383_s4] sm:$0xff]  ;;  %v257_v18 = vunpack.c.l.s4 %v1067_v17  ;;  %v260_v20 = vshrl.u32 %v259_v3, 7  ;;  %s914_s26 = sshll.u32 %s246_s20, 3  ;;  %v281_v32 = vld [vmem:[%s1380_s1 + $0x8] sm:$0xff]  ;;  %vm401_vm6 = vcmask 138240  }
  0x16   : > { %291 = vperm.xlu1 %973, %v283_v8   ;;  %s249_s9 = scalar_lea.vmem %s1379_s0, %s914_s26  ;;  %v280_v31 = vld [vmem:[%s1380_s1] sm:$0xff]  ;;  %s1074_s20 = smov 110   ;;  %vm510_vm7 = vcmask 261120   ;;  %vm495_vm8 = vcmask 146432   ;;  %vm480_vm9 = vcmask 130048   ;;  %vm463_vm10 = vcmask 15360  }
  0x17   : > { %v416_v6 = vadd.s32 128, %v415_v4  ;;  %v421_v7 = vand.u32 15, %v415_v4  ;;  %v258_v19 = vunpack.c.0.s8 %v257_v18  ;;  %v250_v24 = vld [vmem:[%s249_s9] sm:$0xff]  ;;  %s1075_s26 = smov 112   ;;  %vm525_vm11 = vcmask 277504   ;;  %s897_s13 = sshll.u32 %s242_s12, 3 }
  0x18   : > { %vm702_vm12 = vcmask 777216   ;;  %vm681_vm13 = vcmask 785408   ;;  %vm654_vm14 = vcmask 900096   ;;  %vm627_vm15 = vcmask 908288  }
  0x19   : > { %268 = vperm.xlu0 %972, %v265_v2   ;;  %v428_v9 = vand.u32 15, %v416_v6  ;;  %vm441_vm0 = vcmp.ne.s32.totalorder %v421_v7, 0  ;;  %vm447_vm1 = vcmp.ne.s32.totalorder %v421_v7, 15  ;;  %v261_v21 = vsub.s32 %v258_v19, %v260_v20 }
  0x1a   : > { %v1172_v10 = vsel %vm441_vm0, 1.0, %v1063_v5  ;;  %v906_v12 = vsel %vm447_vm1, 1.0, %v1063_v5  ;;  %286 = vperm.xlu1 %973, %v282_v11   ;;  %vm606_vm0 = vcmask 916480   ;;  %vm579_vm1 = vcmask 1031168  }
  0x1b   : > { %vm442_vm2 = vcmp.ne.s32.totalorder %v428_v9, 0  ;;  %vm448_vm3 = vcmp.ne.s32.totalorder %v428_v9, 15 }
  0x1c   : > { %v1177_v13 = vsel %vm442_vm2, 1.0, %v1063_v5  ;;  %v907_v14 = vsel %vm448_vm3, 1.0, %v1063_v5  ;;  %vm552_vm2 = vcmask 1039360   ;;  %vm729_vm3 = vcmask 769024  }
  0x1d   : > { %v974_v15 = vpack.i.bf16 %v1177_v13, %v1172_v10  ;;  %v979_v16 = vpack.i.bf16 %v907_v14, %v906_v12 }
  0x1f   : > { %975 = vrot.lane.b32.xlu0 %v974_v15, %s1064_s17  ;;  %980 = vrot.lane.b32.xlu1 %v979_v16, %s1065_s18  ;;  %s1071_s17 = smov 95   ;;  %s1072_s18 = smov 111  }
  0x23   : > { %985 = vrot.lane.b32.xlu0 %v974_v15, %s1066_s19  ;;  %990 = vrot.lane.b32.xlu1 %v979_v16, %s1069_s15  ;;  %s1073_s19 = smov 96   ;;  %s244_s15 = scalar_lea.vmem [#allocation2], %s897_s13 }
  0x27   : > { %995 = vrot.lane.b32.xlu0 %v979_v16, %s1068_s14  ;;  %s915_s14 = sshll.u32 %s1136_s25, 7 }
  0x90   : > { %v255_v22 = vpop.permute.xlu0 %254 }
  0x91   : > { %v262_v23 = vrot.slane %v255_v22, %v261_v21  ;;  %v292_v33 = vpop.permute.xlu1 %291 }
  0x93   : > { %v264_v26 = vmul.f32 %v262_v23, %v250_v24 }
  0x94   : > { %v269_v25 = vpop.permute.xlu0 %268 }
  0x95   : > { %v276_v27 = vrot.slane %v269_v25, %v261_v21  ;;  %v287_v34 = vpop.permute.xlu1 %286 }
  0x97   : > { %v278_v28 = vadd.f32 %v276_v27, %v264_v26 }
  0x98   : > { %v976_v47 = vpop.permute.xlu0 %975 }
  0x99   : > { %v279_v29 = vmax.f32 %v278_v28, 0.0  ;;  %v981_v49 = vpop.permute.xlu1 %980  ;;  %v977_v58 = vunpack.i.l.bf16 %v976_v47  ;;  %v1216_v60 = vunpack.i.h.bf16 %v976_v47 }
  0x9a   : > { %v982_v62 = vunpack.i.l.bf16 %v981_v49  ;;  %v983_v0 = vunpack.i.h.bf16 %v981_v49 }
  0x9b   : > { %v295_v30 = vcombine.high %v279_v29, %v279_v29  ;;  %v511_v12 = vsel %vm510_vm7, %v977_v58, %v1216_v60 }
  0x9c   : > { %v986_v48 = vpop.permute.xlu0 %985  ;;  %v496_v17 = vsel %vm495_vm8, %v982_v62, %v983_v0 }
  0x9d   : > { %900 = vmatprep.subr.msk.mxu0 %vm303_vm4, %v295_v30  ;;  %v991_v51 = vpop.permute.xlu1 %990  ;;  %v987_v3 = vunpack.i.l.bf16 %v986_v48  ;;  %v988_v4 = vunpack.i.h.bf16 %v986_v48 }
  0x9e   : > { %901 = vmatpush1.msk.msra.mxu0 %vm303_vm4, %v279_v29  ;;  %v993_v8 = vunpack.i.h.bf16 %v991_v51 }
  0x9f   : > { %902 = vmatmul.mubr.msk.f32.vlgmr.msra.gmra.mxu0 %vm296_vm5, %v280_v31  ;;  %v481_v20 = vsel %vm480_vm9, %v987_v3, %v988_v4 }
  0xa0   : > { %378 = vmatprep.mubr.f32.mxu0 %v1063_v5  ;;  %v1192_v50 = vpop.permute.xlu0 %995  ;;  %v992_v5 = vunpack.i.l.bf16 %v991_v51 }
  0xa2   : > { %v464_v23 = vsel %vm463_vm10, %v992_v5, %v993_v8 }
  0xa3   : > { %903 = vmatmul.mubr.msk.f32.gmra.mxu0 %vm296_vm5, %v281_v32 }
 0x15f   : > { %v374_v35 = vpop.f32.mrf.mxu0 }
 0x160   : > { %v375_v36 = vadd.f32 %v374_v35, %v287_v34  ;;  %v998_v35 = vunpack.i.h.bf16 %v1192_v50 }
 0x161   : > { %v376_v37 = vpop.f32.mrf.mxu0 }
 0x162   : > { %v385_v38 = vmax.f32 %v375_v36, 0.0  ;;  %v377_v39 = vadd.f32 %v376_v37, %v287_v34  ;;  %v997_v36 = vunpack.i.l.bf16 %v1192_v50 }
 0x163   : > { %v380_v40 = vpop.f32.mrf.mxu0 }
 0x164   : > { %v386_v41 = vmax.f32 %v377_v39, 0.0  ;;  %v381_v42 = vadd.f32 %v380_v40, %v292_v33  ;;  %393 = vrot.lane.b32.xlu0 %v385_v38, %s1070_s16  ;;  %v526_v38 = vsel %vm525_vm11, %v997_v36, %v998_v35  ;;  %v1293_v40 = vld [vmem:[%s1384_s5] sm:$0xff] }
 0x165   : > { %v382_v43 = vpop.f32.mrf.mxu0 }
 0x166   : > { %v387_v44 = vmax.f32 %v381_v42, 0.0  ;;  %v383_v45 = vadd.f32 %v382_v43, %v292_v33  ;;  %395 = vrot.lane.b32.xlu1 %v386_v41, %s1070_s16  ;;  %v740_v42 = vcombine.high %v1293_v40, %v1293_v40 }
 0x168   : > { %v388_v46 = vmax.f32 %v383_v45, 0.0  ;;  %397 = vrot.lane.b32.xlu0 %v387_v44, %s1070_s16  ;;  %908 = vmatprep.mubr.msk.f32.mxu1 %vm480_vm9, %v740_v42 }
 0x16a   : > { %399 = vrot.lane.b32.xlu1 %v388_v46, %s1070_s16  ;;  %s834_s16 = sshll.u32 %s244_s15, 4  ;;  %s835_s16 = int_to_ptr.vmem [resolvable:$true] %s834_s16 }
 0x1d6   : > { %v394_v52 = vpop.permute.xlu0 %393 }
 0x1d7   : > { %v1195_v53 = vsel %vm401_vm6, 0.0, %v394_v52 }
 0x1d8   : > { %v396_v54 = vpop.permute.xlu1 %395  ;;  %690 = vrot.lane.b32.xlu0 %v1195_v53, %s1071_s17  ;;  %v515_v61 = vmul.f32 %v977_v58, %v1195_v53  ;;  %v500_v1 = vmul.f32 %v982_v62, %v1195_v53  ;;  %v485_v6 = vmul.f32 %v987_v3, %v1195_v53  ;;  %v468_v9 = vmul.f32 %v992_v5, %v1195_v53 }
 0x1d9   : > { %v1200_v55 = vsel %vm401_vm6, %v396_v54, 0.0  ;;  %v1209_v57 = vsel %vm401_vm6, %v394_v52, %v396_v54  ;;  %v530_v45 = vmul.f32 %v997_v36, %v1195_v53 }
 0x1da   : > { %694 = vrot.lane.b32.xlu1 %v1200_v55, %s1071_s17  ;;  %v398_v56 = vpop.permute.xlu0 %397  ;;  %v517_v63 = vmul.f32 %v1216_v60, %v1200_v55  ;;  %v502_v2 = vmul.f32 %v983_v0, %v1200_v55  ;;  %v487_v7 = vmul.f32 %v988_v4, %v1200_v55  ;;  %v470_v11 = vmul.f32 %v993_v8, %v1200_v55 }
 0x1db   : > { %v1214_v59 = vsel %vm401_vm6, 0.0, %v398_v56  ;;  %v516_v15 = vmul.f32 %v511_v12, %v1209_v57  ;;  %v501_v18 = vmul.f32 %v496_v17, %v1209_v57  ;;  %v486_v21 = vmul.f32 %v481_v20, %v1209_v57 }
 0x1dc   : > { %615 = vrot.lane.b32.xlu0 %v1195_v53, %s1072_s18  ;;  %v400_v14 = vpop.permute.xlu1 %399  ;;  %v518_v19 = vmul.f32 %v977_v58, %v1214_v59  ;;  %v503_v22 = vmul.f32 %v982_v62, %v1214_v59  ;;  %v469_v24 = vmul.f32 %v464_v23, %v1209_v57  ;;  %v488_v26 = vmul.f32 %v987_v3, %v1214_v59 }
 0x1dd   : > { %v1245_v16 = vsel %vm401_vm6, %v398_v56, %v400_v14  ;;  %v413_v25 = vsel %vm401_vm6, %v400_v14, 0.0  ;;  %v471_v27 = vmul.f32 %v992_v5, %v1214_v59  ;;  %v531_v39 = vmul.f32 %v526_v38, %v1209_v57 }
 0x1de   : > { %619 = vrot.lane.b32.xlu1 %v1200_v55, %s1072_s18  ;;  %v520_v28 = vmul.f32 %v1216_v60, %v413_v25  ;;  %v519_v29 = vmul.f32 %v511_v12, %v1245_v16  ;;  %v505_v30 = vmul.f32 %v983_v0, %v413_v25  ;;  %v504_v31 = vmul.f32 %v496_v17, %v1245_v16 }
 0x1df   : > { %v490_v32 = vmul.f32 %v988_v4, %v413_v25  ;;  %v489_v33 = vmul.f32 %v481_v20, %v1245_v16  ;;  %v473_v34 = vmul.f32 %v993_v8, %v413_v25  ;;  %v472_v37 = vmul.f32 %v464_v23, %v1245_v16 }
 0x1e0   : > { %692 = vrot.lane.b32.xlu0 %v1209_v57, %s1071_s17  ;;  %v533_v41 = vmul.f32 %v997_v36, %v1214_v59  ;;  %v535_v43 = vmul.f32 %v998_v35, %v413_v25  ;;  %v534_v44 = vmul.f32 %v526_v38, %v1245_v16  ;;  %v532_v46 = vmul.f32 %v998_v35, %v1200_v55 }
 0x1e2   : > { %696 = vrot.lane.b32.xlu1 %v1214_v59, %s1071_s17 }
 0x1e4   : > { %669 = vrot.lane.b32.xlu0 %v515_v61, %s1073_s19 }
 0x1e6   : > { %673 = vrot.lane.b32.xlu1 %v517_v63, %s1073_s19 }
 0x1e8   : > { %642 = vrot.lane.b32.xlu0 %v500_v1, %s1074_s20 }
 0x1ea   : > { %646 = vrot.lane.b32.xlu1 %v502_v2, %s1074_s20 }
 0x1ec   : > { %617 = vrot.lane.b32.xlu0 %v1209_v57, %s1072_s18 }
 0x1ee   : > { %621 = vrot.lane.b32.xlu1 %v1214_v59, %s1072_s18 }
 0x1f0   : > { %594 = vrot.lane.b32.xlu0 %v485_v6, %s1075_s26 }
 0x1f2   : > { %598 = vrot.lane.b32.xlu1 %v487_v7, %s1075_s26 }
 0x1f4   : > { %567 = vrot.lane.b32.xlu0 %v468_v9, %s1076_s28 }
 0x1f6   : > { %571 = vrot.lane.b32.xlu1 %v470_v11, %s1076_s28 }
 0x1f8   : > { %671 = vrot.lane.b32.xlu0 %v516_v15, %s1073_s19 }
 0x1fa   : > { %698 = vrot.lane.b32.xlu1 %v1245_v16, %s1071_s17 }
 0x1fc   : > { %644 = vrot.lane.b32.xlu0 %v501_v18, %s1074_s20 }
 0x1fe   : > { %675 = vrot.lane.b32.xlu1 %v518_v19, %s1073_s19 }
 0x200   : > { %596 = vrot.lane.b32.xlu0 %v486_v21, %s1075_s26 }
 0x202   : > { %648 = vrot.lane.b32.xlu1 %v503_v22, %s1074_s20 }
 0x204   : > { %569 = vrot.lane.b32.xlu0 %v469_v24, %s1076_s28 }
 0x206   : > { %623 = vrot.lane.b32.xlu1 %v1245_v16, %s1072_s18 }
 0x208   : > { %700 = vrot.lane.b32.xlu0 %v413_v25, %s1071_s17 }
 0x20a   : > { %600 = vrot.lane.b32.xlu1 %v488_v26, %s1075_s26 }
 0x20c   : > { %625 = vrot.lane.b32.xlu0 %v413_v25, %s1072_s18 }
 0x20e   : > { %573 = vrot.lane.b32.xlu1 %v471_v27, %s1076_s28 }
 0x210   : > { %550 = vrot.lane.b32.xlu0 %v413_v25, %s1077_s29 }
 0x212   : > { %548 = vrot.lane.b32.xlu1 %v1245_v16, %s1077_s29 }
 0x214   : > { %679 = vrot.lane.b32.xlu0 %v520_v28, %s1073_s19 }
 0x216   : > { %677 = vrot.lane.b32.xlu1 %v519_v29, %s1073_s19  ;;  %s832_s19 = scalar_lea.hbm %s1385_s6, %s915_s14 }
 0x218   : > { %652 = vrot.lane.b32.xlu0 %v505_v30, %s1074_s20 }
 0x21a   : > { %650 = vrot.lane.b32.xlu1 %v504_v31, %s1074_s20  ;;  %s820_s20 = scalar_lea.sflag [#allocation3], %s242_s12 }
 0x21c   : > { %542 = vrot.lane.b32.xlu0 %v1209_v57, %s1077_s29 }
 0x21e   : > { %546 = vrot.lane.b32.xlu1 %v1214_v59, %s1077_s29 }
 0x220   : > { %604 = vrot.lane.b32.xlu0 %v490_v32, %s1075_s26 }
 0x222   : > { %602 = vrot.lane.b32.xlu1 %v489_v33, %s1075_s26  ;;  %s1000_s26 = scalar_lea.vmem %s835_s16, 128 }
 0x223   : > { %p1001_p11 = scmp.ne.s32.totalorder %s835_s16, %s1000_s26 }
 0x224   : > { %577 = vrot.lane.b32.xlu0 %v473_v34, %s1076_s28 }
 0x225   : > { %p1002_p12 = pnand %p1001_p11, %p1153_p5 }
 0x226   : > { %575 = vrot.lane.b32.xlu1 %v472_v37, %s1076_s28  ;;  %s1079_s28 = smov [#allocation2]  }
 0x227   : > { %p1003_p13 = pneg %p1002_p12 }
 0x228   : > { %540 = vrot.lane.b32.xlu0 %v1195_v53, %s1077_s29 }
 0x22a   : > { %544 = vrot.lane.b32.xlu1 %v1200_v55, %s1077_s29  ;;  %s1004_s29 = sshll.u32 %s1079_s28, 4  ;;  %s1005_s29 = int_to_ptr.vmem [resolvable:$false] %s1004_s29 }
 0x22b   : > { %s1006_s25 = scalar_lea.vmem %s1005_s29, 256  ;;  %p1007_p0 = scmp.lt.s32.totalorder %s835_s16, %s1005_s29 }
 0x22c   : > { %719 = vrot.lane.b32.xlu0 %v531_v39, %s1078_s11  ;;  %p1008_p1 = scmp.lt.s32.totalorder %s1006_s25, %s1000_s26 }
 0x22e   : > { %723 = vrot.lane.b32.xlu1 %v533_v41, %s1078_s11  ;;  %p1009_p2 = por %p1008_p1, %p1007_p0 }
 0x230   : > { %727 = vrot.lane.b32.xlu0 %v535_v43, %s1078_s11  ;;  %p1010_p3 = pnand %p1009_p2, %p1003_p13 }
 0x232   : > { %725 = vrot.lane.b32.xlu1 %v534_v44, %s1078_s11 }
 0x234   : > { %717 = vrot.lane.b32.xlu0 %v530_v45, %s1078_s11 }
 0x236   : > { %721 = vrot.lane.b32.xlu1 %v532_v46, %s1078_s11 }
 0x24a   : > { %v691_v47 = vpop.permute.xlu0 %690 }
 0x24c   : > { %v695_v48 = vpop.permute.xlu1 %694 }
 0x24e   : > { %v1302_v49 = vpop.permute.xlu0 %615 }
 0x250   : > { %v1304_v50 = vpop.permute.xlu1 %619 }
 0x252   : > { %v693_v51 = vpop.permute.xlu0 %692 }
 0x253   : > { %v704_v17 = vsel %vm702_vm12, %v693_v51, %v695_v48  ;;  %v703_v19 = vsel %vm702_vm12, %v691_v47, %v693_v51 }
 0x254   : > { %v697_v52 = vpop.permute.xlu1 %696 }
 0x256   : > { %v670_v54 = vpop.permute.xlu0 %669 }
 0x258   : > { %v674_v56 = vpop.permute.xlu1 %673 }
 0x25a   : > { %v643_v58 = vpop.permute.xlu0 %642 }
 0x25c   : > { %v647_v60 = vpop.permute.xlu1 %646 }
 0x25e   : > { %v1306_v61 = vpop.permute.xlu0 %617 }
 0x25f   : > { %v629_v41 = vsel %vm627_vm15, %v1306_v61, %v1304_v50  ;;  %v628_v43 = vsel %vm627_vm15, %v1302_v49, %v1306_v61 }
 0x260   : > { %v622_v62 = vpop.permute.xlu1 %621 }
 0x262   : > { %v1308_v63 = vpop.permute.xlu0 %594 }
 0x264   : > { %v1310_v0 = vpop.permute.xlu1 %598 }
 0x266   : > { %v1312_v55 = vpop.permute.xlu0 %567 }
 0x268   : > { %v1314_v1 = vpop.permute.xlu1 %571 }
 0x26a   : > { %v672_v2 = vpop.permute.xlu0 %671 }
 0x26b   : > { %v683_v28 = vsel %vm681_vm13, %v672_v2, %v674_v56  ;;  %v682_v30 = vsel %vm681_vm13, %v670_v54, %v672_v2 }
 0x26c   : > { %v699_v3 = vpop.permute.xlu1 %698 }
 0x26d   : > { %v705_v15 = vsel %vm702_vm12, %v697_v52, %v699_v3 }
 0x26e   : > { %v645_v4 = vpop.permute.xlu0 %644 }
 0x26f   : > { %v656_v34 = vsel %vm654_vm14, %v645_v4, %v647_v60  ;;  %v655_v36 = vsel %vm654_vm14, %v643_v58, %v645_v4  ;;  %v454_v4 = vmul.f32 %v1177_v13, %v1209_v57 }
 0x270   : > { %v676_v5 = vpop.permute.xlu1 %675 }
 0x272   : > { %v1316_v6 = vpop.permute.xlu0 %596 }
 0x273   : > { %v608_v47 = vsel %vm606_vm0, %v1316_v6, %v1310_v0  ;;  %v607_v50 = vsel %vm606_vm0, %v1308_v63, %v1316_v6 }
 0x274   : > { %v649_v7 = vpop.permute.xlu1 %648 }
 0x276   : > { %v1318_v8 = vpop.permute.xlu0 %569 }
 0x277   : > { %v581_v54 = vsel %vm579_vm1, %v1318_v8, %v1314_v1  ;;  %v580_v58 = vsel %vm579_vm1, %v1312_v55, %v1318_v8  ;;  %v456_v1 = vmul.f32 %v1177_v13, %v1245_v16 }
 0x278   : > { %v624_v9 = vpop.permute.xlu1 %623 }
 0x279   : > { %v630_v39 = vsel %vm627_vm15, %v622_v62, %v624_v9 }
 0x27a   : > { %v701_v11 = vpop.permute.xlu0 %700 }
 0x27b   : > { %v706_v12 = vsel %vm702_vm12, %v699_v3, %v701_v11  ;;  %v455_v3 = vmul.f32 %v1172_v10, %v1214_v59 }
 0x27c   : > { %v601_v14 = vpop.permute.xlu1 %600  ;;  %743 = vmatprep.subr.mxu1 %v706_v12 }
 0x27d   : > { %744 = vmatpush1.msra.mxu1 %v705_v15 }
 0x27e   : > { %745 = vmatprep.subr.mxu1 %v704_v17  ;;  %v626_v18 = vpop.permute.xlu0 %625 }
 0x27f   : > { %746 = vmatpush1.msra.mxu1 %v703_v19  ;;  %v631_v37 = vsel %vm627_vm15, %v624_v9, %v626_v18 }
 0x280   : > { %v574_v20 = vpop.permute.xlu1 %573 }
 0x282   : > { %v551_v21 = vpop.permute.xlu0 %550 }
 0x284   : > { %v1320_v22 = vpop.permute.xlu1 %548 }
 0x285   : > { %v556_v60 = vsel %vm552_vm2, %v1320_v22, %v551_v21 }
 0x286   : > { %v680_v23 = vpop.permute.xlu0 %679 }
 0x288   : > { %v678_v24 = vpop.permute.xlu1 %677 }
 0x289   : > { %v685_v25 = vsel %vm681_vm13, %v678_v24, %v680_v23  ;;  %v684_v26 = vsel %vm681_vm13, %v676_v5, %v678_v24  ;;  %v453_v5 = vmul.f32 %v1172_v10, %v1195_v53 }
 0x28a   : > { %747 = vmatprep.subr.mxu1 %v685_v25  ;;  %v653_v27 = vpop.permute.xlu0 %652 }
 0x28b   : > { %748 = vmatpush1.msra.mxu1 %v684_v26 }
 0x28c   : > { %v651_v29 = vpop.permute.xlu1 %650  ;;  %749 = vmatprep.subr.mxu1 %v683_v28 }
 0x28d   : > { %750 = vmatpush1.msra.mxu1 %v682_v30  ;;  %v658_v31 = vsel %vm654_vm14, %v651_v29, %v653_v27  ;;  %v657_v32 = vsel %vm654_vm14, %v649_v7, %v651_v29 }
 0x28e   : > { %751 = vmatprep.subr.mxu1 %v658_v31  ;;  %v543_v33 = vpop.permute.xlu0 %542 }
 0x28f   : > { %752 = vmatpush1.msra.mxu1 %v657_v32 }
 0x290   : > { %v547_v35 = vpop.permute.xlu1 %546  ;;  %753 = vmatprep.subr.mxu1 %v656_v34 }
 0x291   : > { %754 = vmatpush1.msra.mxu1 %v655_v36  ;;  %v555_v62 = vsel %vm552_vm2, %v547_v35, %v1320_v22 }
 0x292   : > { %755 = vmatprep.subr.mxu1 %v631_v37  ;;  %v605_v38 = vpop.permute.xlu0 %604 }
 0x293   : > { %756 = vmatpush1.msra.mxu1 %v630_v39 }
 0x294   : > { %v603_v42 = vpop.permute.xlu1 %602  ;;  %757 = vmatprep.subr.mxu1 %v629_v41 }
 0x295   : > { %758 = vmatpush1.msra.mxu1 %v628_v43  ;;  %v610_v44 = vsel %vm606_vm0, %v603_v42, %v605_v38  ;;  %v609_v45 = vsel %vm606_vm0, %v601_v14, %v603_v42 }
 0x296   : > { %759 = vmatprep.subr.mxu1 %v610_v44  ;;  %v578_v46 = vpop.permute.xlu0 %577 }
 0x297   : > { %760 = vmatpush1.msra.mxu1 %v609_v45 }
 0x298   : > { %v576_v48 = vpop.permute.xlu1 %575  ;;  %761 = vmatprep.subr.mxu1 %v608_v47 }
 0x299   : > { %762 = vmatpush1.msra.mxu1 %v607_v50  ;;  %v583_v51 = vsel %vm579_vm1, %v576_v48, %v578_v46  ;;  %v582_v52 = vsel %vm579_vm1, %v574_v20, %v576_v48 }
 0x29a   : > { %763 = vmatprep.subr.mxu1 %v583_v51  ;;  %v541_v49 = vpop.permute.xlu0 %540 }
 0x29b   : > { %764 = vmatpush1.msra.mxu1 %v582_v52  ;;  %v553_v2 = vsel %vm552_vm2, %v541_v49, %v543_v33 }
 0x29c   : > { %v545_v56 = vpop.permute.xlu1 %544  ;;  %765 = vmatprep.subr.mxu1 %v581_v54 }
 0x29d   : > { %766 = vmatpush1.msra.mxu1 %v580_v58  ;;  %v554_v63 = vsel %vm552_vm2, %v543_v33, %v545_v56 }
 0x29e   : > { %767 = vmatprep.subr.mxu1 %v556_v60  ;;  %v720_v61 = vpop.permute.xlu0 %719 }
 0x29f   : > { %768 = vmatpush1.msra.mxu1 %v555_v62 }
 0x2a0   : > { %v724_v0 = vpop.permute.xlu1 %723  ;;  %769 = vmatprep.subr.mxu1 %v554_v63 }
 0x2a1   : > { %770 = vmatpush1.msra.mxu1 %v553_v2 }
 0x2a2   : > { %771 = vmatprep.subr.mxu1 %v456_v1  ;;  %v728_v55 = vpop.permute.xlu0 %727 }
 0x2a3   : > { %772 = vmatpush1.msra.mxu1 %v455_v3 }
 0x2a4   : > { %v726_v6 = vpop.permute.xlu1 %725  ;;  %773 = vmatprep.subr.mxu1 %v454_v4 }
 0x2a5   : > { %774 = vmatpush1.msra.mxu1 %v453_v5  ;;  %v733_v16 = vsel %vm729_vm3, %v726_v6, %v728_v55  ;;  %v732_v7 = vsel %vm729_vm3, %v724_v0, %v726_v6 }
 0x2a6   : > { %803 = vmatprep.subr.mxu1 %v733_v16  ;;  %v718_v8 = vpop.permute.xlu0 %717 }
 0x2a7   : > { %804 = vmatpush2.msra.mxu1 %v732_v7  ;;  %v730_v11 = vsel %vm729_vm3, %v718_v8, %v720_v61 }
 0x2a8   : > { %v722_v59 = vpop.permute.xlu1 %721 }
 0x2a9   : > { %v731_v9 = vsel %vm729_vm3, %v720_v61, %v722_v59 }
 0x2aa   : > { %805 = vmatprep.subr.mxu1 %v731_v9 }
 0x2ab   : > { %806 = vmatpush2.msra.mxu1 %v730_v11 }
 0x2ac   : > { %808 = vmatmul.mubr.f32.vlgmr.msra.gmra.mxu1 %v1293_v40 }
 0x36c   : > { %v809_v10 = vpop.f32.mrf.mxu1 }
 0x36e   : > { %v811_v13 = vpop.f32.mrf.mxu1 }
 0x36f   : > { %v816_v53 = vcombine.low %v809_v10, %v811_v13 }
 0x371   : > { %818 = vst [vmem:[%s244_s15] sm:$0xff] %v816_v53 }
 0x372   : > { %1013 = shalt.err (!%p1010_p3)
}
 0x373   : > { %s1014_s9 = scalar_lea.hbm %s832_s19, 128  ;;  %s1018_s12 = scalar_lea.hbm %s1385_s6, 256 }
 0x374   : > { %p1015_p4 = scmp.ne.s32.totalorder %s832_s19, %s1014_s9  ;;  %p1019_p9 = scmp.lt.s32.totalorder %s832_s19, %s1385_s6 }
 0x375   : > { %p1020_p10 = scmp.lt.s32.totalorder %s1018_s12, %s1014_s9 }
 0x376   : > { %p1016_p7 = pnand %p1015_p4, %p1153_p5 }
 0x377   : > { %p1021_p11 = por %p1020_p10, %p1019_p9 }
 0x378   : > { %p1017_p8 = pneg %p1016_p7 }
 0x37a   : > { %p1022_p12 = pnand %p1021_p11, %p1017_p8 }
 0x37c   : > { %1025 = shalt.err (!%p1022_p12)
}
 0x37d   : > { %916 = dma.vmem_to_hbm [thread:$0]  (%p1153_p5), %s835_s16, 128, %s832_s19, %s820_s20  }
 0x37e PF: > { %p922_p13 = scmp.ge.s32.totalorder %s1060_s24, 2  ;;  %s846_s15 = sand.u32 1, %s1048_s21  }
 0x37f   : > { %s847_s17 = scalar_lea.sflag [#allocation3], %s846_s15 }
 0x380   : > { %p919_p0 = pnand %p922_p13, %p1157_p6 }
 0x382   : > { %p920_p1 = pneg %p919_p0 }
 0x384   : > { %1043 = dma.done.wait (%p920_p1), %s847_s17, 128  }
 0x385   : > { %1045 = vsyncadd (%p920_p1), %s847_s17, 4294967168  ;;  %p16_p2 = scmp.ge.s32.totalorder %s1140_s27, 4   ;;  %s1388_s21 = smov %s1052_s22 }
 0x386   : > { %s1389_s22 = smov %s1056_s23  ;;  %s1390_s23 = smov %s1151_s30 }
 0x387   : > { %s1391_s24 = smov %s1140_s27  ;;  %18 = sbr.rel (!%p16_p2) target bundleno = 3 (0x3), region = 79 }
 0x38c   :  { %852 = vsyncpa [#allocation3], 1 }
 0x38d   :  { %854 = vsyncpa [#allocation3 + $0x1], 1 }

</bundles_post_ra>
